<compile_context>
chip_gen: v6e
topology: v6e:2x2x1
jax: 0.10.0
libtpu: 0.0.40
codegen_flags: <defaults>
</compile_context>

<pallas_src>
import math

import jax
import jax.numpy as jnp
from jax.experimental import pallas as pl
from jax.experimental.pallas import tpu as pltpu


def _full_spec(shape):
    nd = len(shape)
    return pl.BlockSpec(shape, lambda i, _nd=nd: (0,) * _nd)


def _row_offsets(Et, D):
    """Static sublane offsets of each tensor inside the packed (rows, 128) parameter slab."""
    return dict(
        wqkv=0,                 # (Et, 3D)
        w1=Et,                  # (Et, 4Et)
        wout=2 * Et,            # (D, D)
        wfcn=2 * Et + D,        # (D, Et)
        w2=2 * Et + 2 * D,      # (4Et, Et)
        vec=6 * Et + 2 * D,     # 9 bias/scale rows: bqkv, bout, bfcn, b1, b2, g1, be1, g2, be2
    )


def _erf(z):
    # TODO(synk): exact erf replaced with Abramowitz-Stegun 7.1.26 approximation
    # (max abs err 1.5e-7, fp32-noise level) to avoid relying on a lax.erf Mosaic lowering.
    a1, a2, a3, a4, a5 = 0.254829592, -0.284496736, 1.421413741, -1.453152027, 1.061405429
    p = 0.3275911
    za = jnp.abs(z)
    t = 1.0 / (1.0 + p * za)        # exact divide kept here for accuracy (cheap at this size)
    poly = ((((a5 * t + a4) * t + a3) * t + a2) * t + a1) * t
    y = 1.0 - poly * jnp.exp(-za * za)
    return jnp.where(z >= 0.0, y, -y)


def _gelu_exact(x):
    return 0.5 * x * (1.0 + _erf(x * 0.7071067811865476))


def _make_kernel(S, B, Et, D, H):
    hd = D // H
    BS = S * B
    off = _row_offsets(Et, D)
    R_WQKV, R_W1, R_WOUT, R_WFCN, R_W2, RV = (
        off["wqkv"], off["w1"], off["wout"], off["wfcn"], off["w2"], off["vec"])

    def mm(a, b):
        # Single-pass bf16 MXU matmul with f32 accumulation.
        return jnp.dot(a.astype(jnp.bfloat16), b.astype(jnp.bfloat16),
                       preferred_element_type=jnp.float32)

    def kernel(x_ref, p_ref, o_ref):
        x2 = x_ref[...]                                         # (BS, Et) f32, residual copy

        # ---- fused (input_to_qkv1 o MHA in-proj): ONE (BS,Et)@(Et,3D) GEMM -------------
        qkv = mm(x2, p_ref[R_WQKV:R_WQKV + Et, :3 * D]) + p_ref[RV + 0:RV + 1, :3 * D]

        # ---- block-diagonal batch mask (rows are seq-major: row = s*B + b) -------------
        ri = jax.lax.broadcasted_iota(jnp.int32, (BS, BS), 0)
        ci = jax.lax.broadcasted_iota(jnp.int32, (BS, BS), 1)
        if (B & (B - 1)) == 0:
            same = (ri & (B - 1)) == (ci & (B - 1))
        else:
            same = (ri % B) == (ci % B)
        neg = jnp.where(same, 0.0, -1e30)                       # f32, added BEFORE row-max

        # ---- per-head masked full-(BS,BS) attention (static unroll over H heads) -------
        ohs = []
        for h in range(H):
            qh = qkv[:, h * hd:(h + 1) * hd]                    # 1/sqrt(hd) already folded in
            kh = qkv[:, D + h * hd:D + (h + 1) * hd]
            vh = qkv[:, 2 * D + h * hd:2 * D + (h + 1) * hd]
            s = mm(qh, kh.T) + neg                              # (BS, BS) f32
            s = s - jnp.max(s, axis=-1, keepdims=True)
            p = jnp.exp(s)                                      # masked entries -> exactly 0
            p = p * pl.reciprocal(jnp.sum(p, axis=-1, keepdims=True), approx=True)
            ohs.append(mm(p, vh))                               # (BS, hd)
        oh = jnp.concatenate(ohs, axis=-1)                      # (BS, D)

        # ---- fused attention out-projection: ONE (BS,D)@(D,D) GEMM ---------------------
        attn = mm(oh, p_ref[R_WOUT:R_WOUT + D, :D]) + p_ref[RV + 1:RV + 2, :D]

        # ---- attn1_to_fcn + residual/1.414 + BatchNorm1d (training batch stats) --------
        b_ = mm(attn, p_ref[R_WFCN:R_WFCN + D, :Et]) + p_ref[RV + 2:RV + 3, :Et]
        b_ = (b_ + x2) * (1.0 / 1.414)
        m1 = jnp.mean(b_, axis=0, keepdims=True)
        v1 = jnp.mean((b_ - m1) ** 2, axis=0, keepdims=True)
        bn = ((b_ - m1) * jax.lax.rsqrt(v1 + 1e-5)
              * p_ref[RV + 5:RV + 6, :Et] + p_ref[RV + 6:RV + 7, :Et])

        # ---- attn1_fcn: Linear -> GELU(exact erf) -> Linear, residual, norm1b ----------
        h1 = mm(bn, p_ref[R_W1:R_W1 + Et, :4 * Et]) + p_ref[RV + 3:RV + 4, :4 * Et]
        h1 = _gelu_exact(h1)
        h2 = mm(h1, p_ref[R_W2:R_W2 + 4 * Et, :Et]) + p_ref[RV + 4:RV + 5, :Et]
        c = (h2 + bn) * (1.0 / 1.414)
        m2 = jnp.mean(c, axis=0, keepdims=True)
        v2 = jnp.mean((c - m2) ** 2, axis=0, keepdims=True)
        o_ref[...] = ((c - m2) * jax.lax.rsqrt(v2 + 1e-5)
                      * p_ref[RV + 7:RV + 8, :Et] + p_ref[RV + 8:RV + 9, :Et])

    return kernel


def transformer_encoder_block(x, param_slab, transformer_dim, nheads):
    """x: (S, B, trans_emb_dim) float32 — matches the PyTorch module's forward."""
    S, B, Et = x.shape
    D, H = transformer_dim, nheads
    assert D % H == 0 and 3 * D <= 128 and 4 * Et <= 128
    x2 = x.reshape(S * B, Et)                                # seq-major rows, no transpose
    kernel = _make_kernel(S, B, Et, D, H)
    out2 = pl.pallas_call(
        kernel,
        grid=(1,),
        in_specs=[_full_spec(x2.shape), _full_spec(param_slab.shape)],
        out_specs=_full_spec((S * B, Et)),
        out_shape=jax.ShapeDtypeStruct((S * B, Et), jnp.float32),
        compiler_params=pltpu.CompilerParams(dimension_semantics=("arbitrary",)),
    )(x2, param_slab)
    return out2.reshape(S, B, Et)


# --------------------------- parameter preparation ---------------------------

def init_raw_params(key, Et, D):
    """Deterministic synthetic parameters in PyTorch orientation (Linear weight=(out,in))."""
    ks = jax.random.split(key, 12)

    def w(k, shape, s=0.1):
        return s * jax.random.normal(k, shape, jnp.float32)

    return dict(
        wqkv=w(ks[0], (3 * D, Et)), bqkv=w(ks[1], (3 * D,)),
        win=w(ks[2], (3 * D, D)),   bin=w(ks[3], (3 * D,)),
        wout=w(ks[4], (D, D)),      bout=w(ks[5], (D,)),
        wfcn=w(ks[6], (Et, D)),     bfcn=w(ks[7], (Et,)),
        w1=w(ks[8], (4 * Et, Et)),  b1=w(ks[9], (4 * Et,)),
        w2=w(ks[10], (Et, 4 * Et)), b2=w(ks[11], (Et,)),
        g1=jnp.ones((Et,), jnp.float32), be1=jnp.zeros((Et,), jnp.float32),
        g2=jnp.ones((Et,), jnp.float32), be2=jnp.zeros((Et,), jnp.float32),
    )


def fuse_params(rp, H):
    """Fold input_to_qkv1 into the MHA in-projection (exact algebra); fold the
    1/sqrt(head_dim) scale into the q path.  Host-side, one-time, full f32 precision."""
    D = rp["wout"].shape[0]
    hd = D // H
    scale = 1.0 / math.sqrt(hd)
    hi = jax.lax.Precision.HIGHEST

    def fused(sl, s):
        w = jnp.matmul(rp["wqkv"][sl].T, rp["win"][sl].T, precision=hi) * s     # (Et, D)
        b = (jnp.matmul(rp["bqkv"][sl], rp["win"][sl].T, precision=hi) + rp["bin"][sl]) * s
        return w, b

    wq, bq = fused(slice(0, D), scale)
    wk, bk = fused(slice(D, 2 * D), 1.0)
    wv, bv = fused(slice(2 * D, 3 * D), 1.0)
    return dict(wq=wq, bq=bq, wk=wk, bk=bk, wv=wv, bv=bv,
                wout=rp["wout"].T, bout=rp["bout"],
                wfcn=rp["wfcn"].T, bfcn=rp["bfcn"],
                w1=rp["w1"].T, b1=rp["b1"], w2=rp["w2"].T, b2=rp["b2"],
                g1=rp["g1"], be1=rp["be1"], g2=rp["g2"], be2=rp["be2"])


def pack_params(fp):
    """Pack every weight / bias / scale into ONE lane-dense (rows, 128) f32 slab."""
    Et, D = fp["wq"].shape
    assert 3 * D <= 128 and 4 * Et <= 128
    off = _row_offsets(Et, D)
    n_rows = ((off["vec"] + 9 + 7) // 8) * 8
    slab = jnp.zeros((n_rows, 128), jnp.float32)
    wqkv = jnp.concatenate([fp["wq"], fp["wk"], fp["wv"]], axis=1)              # (Et, 3D)
    bqkv = jnp.concatenate([fp["bq"], fp["bk"], fp["bv"]])                      # (3D,)
    slab = slab.at[off["wqkv"]:off["wqkv"] + Et, :3 * D].set(wqkv)
    slab = slab.at[off["w1"]:off["w1"] + Et, :4 * Et].set(fp["w1"])
    slab = slab.at[off["wout"]:off["wout"] + D, :D].set(fp["wout"])
    slab = slab.at[off["wfcn"]:off["wfcn"] + D, :Et].set(fp["wfcn"])
    slab = slab.at[off["w2"]:off["w2"] + 4 * Et, :Et].set(fp["w2"])
    rv = off["vec"]
    slab = slab.at[rv + 0, :3 * D].set(bqkv)
    slab = slab.at[rv + 1, :D].set(fp["bout"])
    slab = slab.at[rv + 2, :Et].set(fp["bfcn"])
    slab = slab.at[rv + 3, :4 * Et].set(fp["b1"])
    slab = slab.at[rv + 4, :Et].set(fp["b2"])
    slab = slab.at[rv + 5, :Et].set(fp["g1"])
    slab = slab.at[rv + 6, :Et].set(fp["be1"])
    slab = slab.at[rv + 7, :Et].set(fp["g2"])
    slab = slab.at[rv + 8, :Et].set(fp["be2"])
    return slab


# -------------------------------- references ---------------------------------

def reference_exact(x, rp, H):
    """Pure-JAX, full-f32 (HIGHEST precision), literal transcription of the PyTorch forward
    with the raw (unfused) parameters — the semantic ground truth."""
    S, B, Et = x.shape
    D = rp["wout"].shape[0]
    hd = D // H
    hi = jax.lax.Precision.HIGHEST
    qkv = jnp.matmul(x, rp["wqkv"].T, precision=hi) + rp["bqkv"]
    q, k, v = qkv[..., :D], qkv[..., D:2 * D], qkv[..., 2 * D:]
    q2 = (jnp.matmul(q, rp["win"][:D].T, precision=hi) + rp["bin"][:D]) / math.sqrt(hd)
    k2 = jnp.matmul(k, rp["win"][D:2 * D].T, precision=hi) + rp["bin"][D:2 * D]
    v2 = jnp.matmul(v, rp["win"][2 * D:].T, precision=hi) + rp["bin"][2 * D:]
    q4 = q2.reshape(S, B, H, hd); k4 = k2.reshape(S, B, H, hd); v4 = v2.reshape(S, B, H, hd)
    sc = jnp.einsum("qbhd,kbhd->bhqk", q4, k4, precision=hi)
    p = jax.nn.softmax(sc, axis=-1)
    at = jnp.einsum("bhqk,kbhd->qbhd", p, v4, precision=hi).reshape(S, B, D)
    at = jnp.matmul(at, rp["wout"].T, precision=hi) + rp["bout"]
    bb = jnp.matmul(at, rp["wfcn"].T, precision=hi) + rp["bfcn"]
    bb = bb / 1.414 + x / 1.414
    m1 = bb.mean(axis=(0, 1)); v1 = ((bb - m1) ** 2).mean(axis=(0, 1))
    bb = (bb - m1) / jnp.sqrt(v1 + 1e-5) * rp["g1"] + rp["be1"]
    h1 = jax.nn.gelu(jnp.matmul(bb, rp["w1"].T, precision=hi) + rp["b1"], approximate=False)
    cc = (jnp.matmul(h1, rp["w2"].T, precision=hi) + rp["b2"]) / 1.414 + bb / 1.414
    m2 = cc.mean(axis=(0, 1)); v2_ = ((cc - m2) ** 2).mean(axis=(0, 1))
    return (cc - m2) / jnp.sqrt(v2_ + 1e-5) * rp["g2"] + rp["be2"]


def reference_fused_bf16(x, fp, H):
    """Mirrors the kernel's math (fused pre-scaled weights, flat seq-major rows, masked
    full-(BS,BS) attention, bf16 MXU operands / f32 accumulation) so the kernel can be
    checked at a tight tolerance."""
    S, B, Et = x.shape
    D = fp["wq"].shape[1]
    hd = D // H

    def mm(a, b):
        return jnp.matmul(a.astype(jnp.bfloat16), b.astype(jnp.bfloat16),
                          preferred_element_type=jnp.float32)

    x2 = x.reshape(S * B, Et)
    wqkv = jnp.concatenate([fp["wq"], fp["wk"], fp["wv"]], axis=1)
    bqkv = jnp.concatenate([fp["bq"], fp["bk"], fp["bv"]])
    qkv = mm(x2, wqkv) + bqkv
    ri = jnp.arange(S * B)[:, None]; ci = jnp.arange(S * B)[None, :]
    neg = jnp.where((ri % B) == (ci % B), 0.0, -1e30)
    ohs = []
    for h in range(H):
        qh = qkv[:, h * hd:(h + 1) * hd]
        kh = qkv[:, D + h * hd:D + (h + 1) * hd]
        vh = qkv[:, 2 * D + h * hd:2 * D + (h + 1) * hd]
        s = mm(qh, kh.T) + neg
        ohs.append(mm(jax.nn.softmax(s, axis=-1), vh))
    oh = jnp.concatenate(ohs, axis=-1)
    at = mm(oh, fp["wout"]) + fp["bout"]
    bb = (mm(at, fp["wfcn"]) + fp["bfcn"] + x2) * (1.0 / 1.414)
    m1 = bb.mean(0); v1 = ((bb - m1) ** 2).mean(0)
    bb = (bb - m1) * jax.lax.rsqrt(v1 + 1e-5) * fp["g1"] + fp["be1"]
    h1 = jax.nn.gelu(mm(bb, fp["w1"]) + fp["b1"], approximate=False)
    cc = (mm(h1, fp["w2"]) + fp["b2"] + bb) * (1.0 / 1.414)
    m2 = cc.mean(0); v2_ = ((cc - m2) ** 2).mean(0)
    out2 = (cc - m2) * jax.lax.rsqrt(v2_ + 1e-5) * fp["g2"] + fp["be2"]
    return out2.reshape(S, B, Et)


if __name__ == "__main__":
    S, B = 8, 2
    trans_emb_dim, transformer_dim, nheads = 16, 32, 4

    key = jax.random.PRNGKey(0)
    kx, kp = jax.random.split(key)
    x = jax.random.normal(kx, (S, B, trans_emb_dim), jnp.float32)

    raw = init_raw_params(kp, trans_emb_dim, transformer_dim)
    fused = fuse_params(raw, nheads)
    slab = pack_params(fused)

    out = transformer_encoder_block(x, slab, transformer_dim, nheads)
    out = jax.block_until_ready(out)
    assert out.shape == (S, B, trans_emb_dim), out.shape

    # Check against a reference that mirrors the kernel's bf16-MXU math (only deviations:
    # approx softmax reciprocal, A&S erf, accumulation order).
    ref_strict = reference_fused_bf16(x, fused, nheads)
    assert bool(jnp.allclose(out, ref_strict, atol=5e-3, rtol=5e-3)), \
        "mismatch vs bf16-matched reference"
    # Looser check against the exact-f32, unfused PyTorch-math reference (only deviation is
    # the review-endorsed bf16 rounding of MXU operands).
    ref_exact = reference_exact(x, raw, nheads)
    assert bool(jnp.allclose(out, ref_exact, atol=3e-2, rtol=3e-2)), \
        "mismatch vs exact f32 PyTorch-math reference"
    print("KERNEL_OK")
</pallas_src>

<mosaic_0001>
module attributes {stable_mosaic.version = 11 : i64} {
  func.func @kernel(%arg0: i32, %arg1: memref<16x16xf32, #tpu.memory_space<vmem>>, %arg2: memref<176x128xf32, #tpu.memory_space<vmem>>, %arg3: memref<16x16xf32, #tpu.memory_space<vmem>>) attributes {dimension_semantics = [#tpu.dimension_semantics<arbitrary>], iteration_bounds = array<i64: 1>, scalar_prefetch = 0 : i64, scratch_operands = 0 : i64, tpu.core_type = #tpu.core_type<tc>, window_params = [{pipeline_mode = #tpu.pipeline_mode<synchronous>, transform_indices = @transform_0, window_bounds = array<i64: 16, 16>}, {pipeline_mode = #tpu.pipeline_mode<synchronous>, transform_indices = @transform_1, window_bounds = array<i64: 176, 128>}, {pipeline_mode = #tpu.pipeline_mode<synchronous>, transform_indices = @transform_2, window_bounds = array<i64: 16, 16>}]} {
    %c0 = arith.constant 0 : index
    %c0_0 = arith.constant 0 : index
    %0 = vector.load %arg1[%c0, %c0_0] : memref<16x16xf32, #tpu.memory_space<vmem>>, vector<16x16xf32>
    %c0_1 = arith.constant 0 : index
    %c0_2 = arith.constant 0 : index
    %1 = vector.load %arg2[%c0_1, %c0_2] : memref<176x128xf32, #tpu.memory_space<vmem>>, vector<16x96xf32>
    %2 = arith.truncf %0 : vector<16x16xf32> to vector<16x16xbf16>
    %3 = arith.truncf %1 : vector<16x96xf32> to vector<16x96xbf16>
    %cst = arith.constant dense<0.000000e+00> : vector<16x96xf32>
    %4 = tpu.matmul %2, %3, %cst {dimension_numbers = #tpu.dot_dimension_numbers<[1], [0], [0], [1], [0, 0, 1, 1], [], []>} : vector<16x16xbf16>, vector<16x96xbf16>, vector<16x96xf32> -> vector<16x96xf32>
    %c160 = arith.constant 160 : index
    %c0_3 = arith.constant 0 : index
    %5 = vector.load %arg2[%c160, %c0_3] : memref<176x128xf32, #tpu.memory_space<vmem>>, vector<1x96xf32>
    %6 = vector.broadcast %5 : vector<1x96xf32> to vector<16x96xf32>
    %7 = arith.addf %4, %6 : vector<16x96xf32>
    %8 = tpu.iota {dimensions = array<i32: 0>} : vector<16x16xi32>
    %9 = tpu.iota {dimensions = array<i32: 1>} : vector<16x16xi32>
    %c1_i32 = arith.constant 1 : i32
    %10 = vector.broadcast %c1_i32 : i32 to vector<16x16xi32>
    %11 = arith.andi %8, %10 : vector<16x16xi32>
    %c1_i32_4 = arith.constant 1 : i32
    %12 = vector.broadcast %c1_i32_4 : i32 to vector<16x16xi32>
    %13 = arith.andi %9, %12 : vector<16x16xi32>
    %14 = arith.cmpi eq, %11, %13 : vector<16x16xi32>
    %cst_5 = arith.constant 0.000000e+00 : f32
    %cst_6 = arith.constant -1.000000e+30 : f32
    %15 = vector.broadcast %cst_5 : f32 to vector<16x16xf32>
    %16 = vector.broadcast %cst_6 : f32 to vector<16x16xf32>
    %17 = arith.select %14, %15, %16 : vector<16x16xi1>, vector<16x16xf32>
    %18 = vector.extract_strided_slice %7 {offsets = [0, 0], sizes = [16, 8], strides = [1, 1]} : vector<16x96xf32> to vector<16x8xf32>
    %19 = vector.extract_strided_slice %7 {offsets = [0, 32], sizes = [16, 8], strides = [1, 1]} : vector<16x96xf32> to vector<16x8xf32>
    %20 = vector.extract_strided_slice %7 {offsets = [0, 64], sizes = [16, 8], strides = [1, 1]} : vector<16x96xf32> to vector<16x8xf32>
    %21 = tpu.transpose %19, [1, 0] : vector<16x8xf32> -> vector<8x16xf32>
    %22 = arith.truncf %18 : vector<16x8xf32> to vector<16x8xbf16>
    %23 = arith.truncf %21 : vector<8x16xf32> to vector<8x16xbf16>
    %cst_7 = arith.constant dense<0.000000e+00> : vector<16x16xf32>
    %24 = tpu.matmul %22, %23, %cst_7 {dimension_numbers = #tpu.dot_dimension_numbers<[1], [0], [0], [1], [0, 0, 1, 1], [], []>} : vector<16x8xbf16>, vector<8x16xbf16>, vector<16x16xf32> -> vector<16x16xf32>
    %25 = arith.addf %24, %17 : vector<16x16xf32>
    %cst_8 = arith.constant dense<0xFF800000> : vector<16xf32>
    %26 = vector.multi_reduction <maximumf>, %25, %cst_8 [1] : vector<16x16xf32> to vector<16xf32>
    %27 = vector.shape_cast %26 : vector<16xf32> to vector<16x1xf32>
    %28 = vector.broadcast %27 : vector<16x1xf32> to vector<16x16xf32>
    %29 = arith.subf %25, %28 : vector<16x16xf32>
    %30 = math.exp %29 : vector<16x16xf32>
    %cst_9 = arith.constant dense<0.000000e+00> : vector<16xf32>
    %31 = vector.multi_reduction <add>, %30, %cst_9 [1] : vector<16x16xf32> to vector<16xf32>
    %32 = vector.shape_cast %31 : vector<16xf32> to vector<16x1xf32>
    %33 = tpu.reciprocal %32 {approx = true} : vector<16x1xf32> -> vector<16x1xf32>
    %34 = vector.broadcast %33 : vector<16x1xf32> to vector<16x16xf32>
    %35 = arith.mulf %30, %34 : vector<16x16xf32>
    %36 = arith.truncf %35 : vector<16x16xf32> to vector<16x16xbf16>
    %37 = arith.truncf %20 : vector<16x8xf32> to vector<16x8xbf16>
    %cst_10 = arith.constant dense<0.000000e+00> : vector<16x8xf32>
    %38 = tpu.matmul %36, %37, %cst_10 {dimension_numbers = #tpu.dot_dimension_numbers<[1], [0], [0], [1], [0, 0, 1, 1], [], []>} : vector<16x16xbf16>, vector<16x8xbf16>, vector<16x8xf32> -> vector<16x8xf32>
    %39 = vector.extract_strided_slice %7 {offsets = [0, 8], sizes = [16, 8], strides = [1, 1]} : vector<16x96xf32> to vector<16x8xf32>
    %40 = vector.extract_strided_slice %7 {offsets = [0, 40], sizes = [16, 8], strides = [1, 1]} : vector<16x96xf32> to vector<16x8xf32>
    %41 = vector.extract_strided_slice %7 {offsets = [0, 72], sizes = [16, 8], strides = [1, 1]} : vector<16x96xf32> to vector<16x8xf32>
    %42 = tpu.transpose %40, [1, 0] : vector<16x8xf32> -> vector<8x16xf32>
    %43 = arith.truncf %39 : vector<16x8xf32> to vector<16x8xbf16>
    %44 = arith.truncf %42 : vector<8x16xf32> to vector<8x16xbf16>
    %cst_11 = arith.constant dense<0.000000e+00> : vector<16x16xf32>
    %45 = tpu.matmul %43, %44, %cst_11 {dimension_numbers = #tpu.dot_dimension_numbers<[1], [0], [0], [1], [0, 0, 1, 1], [], []>} : vector<16x8xbf16>, vector<8x16xbf16>, vector<16x16xf32> -> vector<16x16xf32>
    %46 = arith.addf %45, %17 : vector<16x16xf32>
    %cst_12 = arith.constant dense<0xFF800000> : vector<16xf32>
    %47 = vector.multi_reduction <maximumf>, %46, %cst_12 [1] : vector<16x16xf32> to vector<16xf32>
    %48 = vector.shape_cast %47 : vector<16xf32> to vector<16x1xf32>
    %49 = vector.broadcast %48 : vector<16x1xf32> to vector<16x16xf32>
    %50 = arith.subf %46, %49 : vector<16x16xf32>
    %51 = math.exp %50 : vector<16x16xf32>
    %cst_13 = arith.constant dense<0.000000e+00> : vector<16xf32>
    %52 = vector.multi_reduction <add>, %51, %cst_13 [1] : vector<16x16xf32> to vector<16xf32>
    %53 = vector.shape_cast %52 : vector<16xf32> to vector<16x1xf32>
    %54 = tpu.reciprocal %53 {approx = true} : vector<16x1xf32> -> vector<16x1xf32>
    %55 = vector.broadcast %54 : vector<16x1xf32> to vector<16x16xf32>
    %56 = arith.mulf %51, %55 : vector<16x16xf32>
    %57 = arith.truncf %56 : vector<16x16xf32> to vector<16x16xbf16>
    %58 = arith.truncf %41 : vector<16x8xf32> to vector<16x8xbf16>
    %cst_14 = arith.constant dense<0.000000e+00> : vector<16x8xf32>
    %59 = tpu.matmul %57, %58, %cst_14 {dimension_numbers = #tpu.dot_dimension_numbers<[1], [0], [0], [1], [0, 0, 1, 1], [], []>} : vector<16x16xbf16>, vector<16x8xbf16>, vector<16x8xf32> -> vector<16x8xf32>
    %60 = vector.extract_strided_slice %7 {offsets = [0, 16], sizes = [16, 8], strides = [1, 1]} : vector<16x96xf32> to vector<16x8xf32>
    %61 = vector.extract_strided_slice %7 {offsets = [0, 48], sizes = [16, 8], strides = [1, 1]} : vector<16x96xf32> to vector<16x8xf32>
    %62 = vector.extract_strided_slice %7 {offsets = [0, 80], sizes = [16, 8], strides = [1, 1]} : vector<16x96xf32> to vector<16x8xf32>
    %63 = tpu.transpose %61, [1, 0] : vector<16x8xf32> -> vector<8x16xf32>
    %64 = arith.truncf %60 : vector<16x8xf32> to vector<16x8xbf16>
    %65 = arith.truncf %63 : vector<8x16xf32> to vector<8x16xbf16>
    %cst_15 = arith.constant dense<0.000000e+00> : vector<16x16xf32>
    %66 = tpu.matmul %64, %65, %cst_15 {dimension_numbers = #tpu.dot_dimension_numbers<[1], [0], [0], [1], [0, 0, 1, 1], [], []>} : vector<16x8xbf16>, vector<8x16xbf16>, vector<16x16xf32> -> vector<16x16xf32>
    %67 = arith.addf %66, %17 : vector<16x16xf32>
    %cst_16 = arith.constant dense<0xFF800000> : vector<16xf32>
    %68 = vector.multi_reduction <maximumf>, %67, %cst_16 [1] : vector<16x16xf32> to vector<16xf32>
    %69 = vector.shape_cast %68 : vector<16xf32> to vector<16x1xf32>
    %70 = vector.broadcast %69 : vector<16x1xf32> to vector<16x16xf32>
    %71 = arith.subf %67, %70 : vector<16x16xf32>
    %72 = math.exp %71 : vector<16x16xf32>
    %cst_17 = arith.constant dense<0.000000e+00> : vector<16xf32>
    %73 = vector.multi_reduction <add>, %72, %cst_17 [1] : vector<16x16xf32> to vector<16xf32>
    %74 = vector.shape_cast %73 : vector<16xf32> to vector<16x1xf32>
    %75 = tpu.reciprocal %74 {approx = true} : vector<16x1xf32> -> vector<16x1xf32>
    %76 = vector.broadcast %75 : vector<16x1xf32> to vector<16x16xf32>
    %77 = arith.mulf %72, %76 : vector<16x16xf32>
    %78 = arith.truncf %77 : vector<16x16xf32> to vector<16x16xbf16>
    %79 = arith.truncf %62 : vector<16x8xf32> to vector<16x8xbf16>
    %cst_18 = arith.constant dense<0.000000e+00> : vector<16x8xf32>
    %80 = tpu.matmul %78, %79, %cst_18 {dimension_numbers = #tpu.dot_dimension_numbers<[1], [0], [0], [1], [0, 0, 1, 1], [], []>} : vector<16x16xbf16>, vector<16x8xbf16>, vector<16x8xf32> -> vector<16x8xf32>
    %81 = vector.extract_strided_slice %7 {offsets = [0, 24], sizes = [16, 8], strides = [1, 1]} : vector<16x96xf32> to vector<16x8xf32>
    %82 = vector.extract_strided_slice %7 {offsets = [0, 56], sizes = [16, 8], strides = [1, 1]} : vector<16x96xf32> to vector<16x8xf32>
    %83 = vector.extract_strided_slice %7 {offsets = [0, 88], sizes = [16, 8], strides = [1, 1]} : vector<16x96xf32> to vector<16x8xf32>
    %84 = tpu.transpose %82, [1, 0] : vector<16x8xf32> -> vector<8x16xf32>
    %85 = arith.truncf %81 : vector<16x8xf32> to vector<16x8xbf16>
    %86 = arith.truncf %84 : vector<8x16xf32> to vector<8x16xbf16>
    %cst_19 = arith.constant dense<0.000000e+00> : vector<16x16xf32>
    %87 = tpu.matmul %85, %86, %cst_19 {dimension_numbers = #tpu.dot_dimension_numbers<[1], [0], [0], [1], [0, 0, 1, 1], [], []>} : vector<16x8xbf16>, vector<8x16xbf16>, vector<16x16xf32> -> vector<16x16xf32>
    %88 = arith.addf %87, %17 : vector<16x16xf32>
    %cst_20 = arith.constant dense<0xFF800000> : vector<16xf32>
    %89 = vector.multi_reduction <maximumf>, %88, %cst_20 [1] : vector<16x16xf32> to vector<16xf32>
    %90 = vector.shape_cast %89 : vector<16xf32> to vector<16x1xf32>
    %91 = vector.broadcast %90 : vector<16x1xf32> to vector<16x16xf32>
    %92 = arith.subf %88, %91 : vector<16x16xf32>
    %93 = math.exp %92 : vector<16x16xf32>
    %cst_21 = arith.constant dense<0.000000e+00> : vector<16xf32>
    %94 = vector.multi_reduction <add>, %93, %cst_21 [1] : vector<16x16xf32> to vector<16xf32>
    %95 = vector.shape_cast %94 : vector<16xf32> to vector<16x1xf32>
    %96 = tpu.reciprocal %95 {approx = true} : vector<16x1xf32> -> vector<16x1xf32>
    %97 = vector.broadcast %96 : vector<16x1xf32> to vector<16x16xf32>
    %98 = arith.mulf %93, %97 : vector<16x16xf32>
    %99 = arith.truncf %98 : vector<16x16xf32> to vector<16x16xbf16>
    %100 = arith.truncf %83 : vector<16x8xf32> to vector<16x8xbf16>
    %cst_22 = arith.constant dense<0.000000e+00> : vector<16x8xf32>
    %101 = tpu.matmul %99, %100, %cst_22 {dimension_numbers = #tpu.dot_dimension_numbers<[1], [0], [0], [1], [0, 0, 1, 1], [], []>} : vector<16x16xbf16>, vector<16x8xbf16>, vector<16x8xf32> -> vector<16x8xf32>
    %102 = tpu.concatenate %38, %59, %80, %101 in 1 : vector<16x8xf32>, vector<16x8xf32>, vector<16x8xf32>, vector<16x8xf32> -> vector<16x32xf32>
    %c32 = arith.constant 32 : index
    %c0_23 = arith.constant 0 : index
    %103 = vector.load %arg2[%c32, %c0_23] : memref<176x128xf32, #tpu.memory_space<vmem>>, vector<32x32xf32>
    %104 = arith.truncf %102 : vector<16x32xf32> to vector<16x32xbf16>
    %105 = arith.truncf %103 : vector<32x32xf32> to vector<32x32xbf16>
    %cst_24 = arith.constant dense<0.000000e+00> : vector<16x32xf32>
    %106 = tpu.matmul %104, %105, %cst_24 {dimension_numbers = #tpu.dot_dimension_numbers<[1], [0], [0], [1], [0, 0, 1, 1], [], []>} : vector<16x32xbf16>, vector<32x32xbf16>, vector<16x32xf32> -> vector<16x32xf32>
    %c161 = arith.constant 161 : index
    %c0_25 = arith.constant 0 : index
    %107 = vector.load %arg2[%c161, %c0_25] : memref<176x128xf32, #tpu.memory_space<vmem>>, vector<1x32xf32>
    %108 = vector.broadcast %107 : vector<1x32xf32> to vector<16x32xf32>
    %109 = arith.addf %106, %108 : vector<16x32xf32>
    %c64 = arith.constant 64 : index
    %c0_26 = arith.constant 0 : index
    %110 = vector.load %arg2[%c64, %c0_26] : memref<176x128xf32, #tpu.memory_space<vmem>>, vector<32x16xf32>
    %111 = arith.truncf %109 : vector<16x32xf32> to vector<16x32xbf16>
    %112 = arith.truncf %110 : vector<32x16xf32> to vector<32x16xbf16>
    %cst_27 = arith.constant dense<0.000000e+00> : vector<16x16xf32>
    %113 = tpu.matmul %111, %112, %cst_27 {dimension_numbers = #tpu.dot_dimension_numbers<[1], [0], [0], [1], [0, 0, 1, 1], [], []>} : vector<16x32xbf16>, vector<32x16xbf16>, vector<16x16xf32> -> vector<16x16xf32>
    %c162 = arith.constant 162 : index
    %c0_28 = arith.constant 0 : index
    %114 = vector.load %arg2[%c162, %c0_28] : memref<176x128xf32, #tpu.memory_space<vmem>>, vector<1x16xf32>
    %115 = vector.broadcast %114 : vector<1x16xf32> to vector<16x16xf32>
    %116 = arith.addf %113, %115 : vector<16x16xf32>
    %117 = arith.addf %116, %0 : vector<16x16xf32>
    %cst_29 = arith.constant 0.70721358 : f32
    %118 = vector.broadcast %cst_29 : f32 to vector<16x16xf32>
    %119 = arith.mulf %117, %118 : vector<16x16xf32>
    %cst_30 = arith.constant dense<0.000000e+00> : vector<16xf32>
    %120 = vector.multi_reduction <add>, %119, %cst_30 [0] : vector<16x16xf32> to vector<16xf32>
    %121 = vector.shape_cast %120 : vector<16xf32> to vector<1x16xf32>
    %cst_31 = arith.constant 1.600000e+01 : f32
    %122 = vector.broadcast %cst_31 : f32 to vector<1x16xf32>
    %123 = arith.divf %121, %122 : vector<1x16xf32>
    %124 = vector.broadcast %123 : vector<1x16xf32> to vector<16x16xf32>
    %125 = arith.subf %119, %124 : vector<16x16xf32>
    %126 = arith.mulf %125, %125 : vector<16x16xf32>
    %cst_32 = arith.constant dense<0.000000e+00> : vector<16xf32>
    %127 = vector.multi_reduction <add>, %126, %cst_32 [0] : vector<16x16xf32> to vector<16xf32>
    %128 = vector.shape_cast %127 : vector<16xf32> to vector<1x16xf32>
    %cst_33 = arith.constant 1.600000e+01 : f32
    %129 = vector.broadcast %cst_33 : f32 to vector<1x16xf32>
    %130 = arith.divf %128, %129 : vector<1x16xf32>
    %131 = vector.broadcast %123 : vector<1x16xf32> to vector<16x16xf32>
    %132 = arith.subf %119, %131 : vector<16x16xf32>
    %cst_34 = arith.constant 9.99999974E-6 : f32
    %133 = vector.broadcast %cst_34 : f32 to vector<1x16xf32>
    %134 = arith.addf %130, %133 : vector<1x16xf32>
    %135 = math.rsqrt %134 : vector<1x16xf32>
    %136 = vector.broadcast %135 : vector<1x16xf32> to vector<16x16xf32>
    %137 = arith.mulf %132, %136 : vector<16x16xf32>
    %c165 = arith.constant 165 : index
    %c0_35 = arith.constant 0 : index
    %138 = vector.load %arg2[%c165, %c0_35] : memref<176x128xf32, #tpu.memory_space<vmem>>, vector<1x16xf32>
    %139 = vector.broadcast %138 : vector<1x16xf32> to vector<16x16xf32>
    %140 = arith.mulf %137, %139 : vector<16x16xf32>
    %c166 = arith.constant 166 : index
    %c0_36 = arith.constant 0 : index
    %141 = vector.load %arg2[%c166, %c0_36] : memref<176x128xf32, #tpu.memory_space<vmem>>, vector<1x16xf32>
    %142 = vector.broadcast %141 : vector<1x16xf32> to vector<16x16xf32>
    %143 = arith.addf %140, %142 : vector<16x16xf32>
    %c16 = arith.constant 16 : index
    %c0_37 = arith.constant 0 : index
    %144 = vector.load %arg2[%c16, %c0_37] : memref<176x128xf32, #tpu.memory_space<vmem>>, vector<16x64xf32>
    %145 = arith.truncf %143 : vector<16x16xf32> to vector<16x16xbf16>
    %146 = arith.truncf %144 : vector<16x64xf32> to vector<16x64xbf16>
    %cst_38 = arith.constant dense<0.000000e+00> : vector<16x64xf32>
    %147 = tpu.matmul %145, %146, %cst_38 {dimension_numbers = #tpu.dot_dimension_numbers<[1], [0], [0], [1], [0, 0, 1, 1], [], []>} : vector<16x16xbf16>, vector<16x64xbf16>, vector<16x64xf32> -> vector<16x64xf32>
    %c163 = arith.constant 163 : index
    %c0_39 = arith.constant 0 : index
    %148 = vector.load %arg2[%c163, %c0_39] : memref<176x128xf32, #tpu.memory_space<vmem>>, vector<1x64xf32>
    %149 = vector.broadcast %148 : vector<1x64xf32> to vector<16x64xf32>
    %150 = arith.addf %147, %149 : vector<16x64xf32>
    %cst_40 = arith.constant 5.000000e-01 : f32
    %151 = vector.broadcast %cst_40 : f32 to vector<16x64xf32>
    %152 = arith.mulf %151, %150 : vector<16x64xf32>
    %cst_41 = arith.constant 0.707106769 : f32
    %153 = vector.broadcast %cst_41 : f32 to vector<16x64xf32>
    %154 = arith.mulf %150, %153 : vector<16x64xf32>
    %155 = math.absf %154 : vector<16x64xf32>
    %cst_42 = arith.constant 0.327591091 : f32
    %156 = vector.broadcast %cst_42 : f32 to vector<16x64xf32>
    %157 = arith.mulf %156, %155 : vector<16x64xf32>
    %cst_43 = arith.constant 1.000000e+00 : f32
    %158 = vector.broadcast %cst_43 : f32 to vector<16x64xf32>
    %159 = arith.addf %158, %157 : vector<16x64xf32>
    %cst_44 = arith.constant 1.000000e+00 : f32
    %160 = vector.broadcast %cst_44 : f32 to vector<16x64xf32>
    %161 = arith.divf %160, %159 : vector<16x64xf32>
    %cst_45 = arith.constant 1.06140542 : f32
    %162 = vector.broadcast %cst_45 : f32 to vector<16x64xf32>
    %163 = arith.mulf %162, %161 : vector<16x64xf32>
    %cst_46 = arith.constant -1.45315206 : f32
    %164 = vector.broadcast %cst_46 : f32 to vector<16x64xf32>
    %165 = arith.addf %163, %164 : vector<16x64xf32>
    %166 = arith.mulf %165, %161 : vector<16x64xf32>
    %cst_47 = arith.constant 1.42141378 : f32
    %167 = vector.broadcast %cst_47 : f32 to vector<16x64xf32>
    %168 = arith.addf %166, %167 : vector<16x64xf32>
    %169 = arith.mulf %168, %161 : vector<16x64xf32>
    %cst_48 = arith.constant -0.284496725 : f32
    %170 = vector.broadcast %cst_48 : f32 to vector<16x64xf32>
    %171 = arith.addf %169, %170 : vector<16x64xf32>
    %172 = arith.mulf %171, %161 : vector<16x64xf32>
    %cst_49 = arith.constant 0.254829586 : f32
    %173 = vector.broadcast %cst_49 : f32 to vector<16x64xf32>
    %174 = arith.addf %172, %173 : vector<16x64xf32>
    %175 = arith.mulf %174, %161 : vector<16x64xf32>
    %cst_50 = arith.constant 0.000000e+00 : f32
    %176 = vector.broadcast %cst_50 : f32 to vector<16x64xf32>
    %177 = arith.subf %176, %155 : vector<16x64xf32>
    %178 = arith.mulf %177, %155 : vector<16x64xf32>
    %179 = math.exp %178 : vector<16x64xf32>
    %180 = arith.mulf %175, %179 : vector<16x64xf32>
    %cst_51 = arith.constant 1.000000e+00 : f32
    %181 = vector.broadcast %cst_51 : f32 to vector<16x64xf32>
    %182 = arith.subf %181, %180 : vector<16x64xf32>
    %cst_52 = arith.constant 0.000000e+00 : f32
    %183 = vector.broadcast %cst_52 : f32 to vector<16x64xf32>
    %184 = arith.cmpf oge, %154, %183 : vector<16x64xf32>
    %cst_53 = arith.constant 0.000000e+00 : f32
    %185 = vector.broadcast %cst_53 : f32 to vector<16x64xf32>
    %186 = arith.subf %185, %182 : vector<16x64xf32>
    %187 = arith.select %184, %182, %186 : vector<16x64xi1>, vector<16x64xf32>
    %cst_54 = arith.constant 1.000000e+00 : f32
    %188 = vector.broadcast %cst_54 : f32 to vector<16x64xf32>
    %189 = arith.addf %188, %187 : vector<16x64xf32>
    %190 = arith.mulf %152, %189 : vector<16x64xf32>
    %c96 = arith.constant 96 : index
    %c0_55 = arith.constant 0 : index
    %191 = vector.load %arg2[%c96, %c0_55] : memref<176x128xf32, #tpu.memory_space<vmem>>, vector<64x16xf32>
    %192 = arith.truncf %190 : vector<16x64xf32> to vector<16x64xbf16>
    %193 = arith.truncf %191 : vector<64x16xf32> to vector<64x16xbf16>
    %cst_56 = arith.constant dense<0.000000e+00> : vector<16x16xf32>
    %194 = tpu.matmul %192, %193, %cst_56 {dimension_numbers = #tpu.dot_dimension_numbers<[1], [0], [0], [1], [0, 0, 1, 1], [], []>} : vector<16x64xbf16>, vector<64x16xbf16>, vector<16x16xf32> -> vector<16x16xf32>
    %c164 = arith.constant 164 : index
    %c0_57 = arith.constant 0 : index
    %195 = vector.load %arg2[%c164, %c0_57] : memref<176x128xf32, #tpu.memory_space<vmem>>, vector<1x16xf32>
    %196 = vector.broadcast %195 : vector<1x16xf32> to vector<16x16xf32>
    %197 = arith.addf %194, %196 : vector<16x16xf32>
    %198 = arith.addf %197, %143 : vector<16x16xf32>
    %cst_58 = arith.constant 0.70721358 : f32
    %199 = vector.broadcast %cst_58 : f32 to vector<16x16xf32>
    %200 = arith.mulf %198, %199 : vector<16x16xf32>
    %cst_59 = arith.constant dense<0.000000e+00> : vector<16xf32>
    %201 = vector.multi_reduction <add>, %200, %cst_59 [0] : vector<16x16xf32> to vector<16xf32>
    %202 = vector.shape_cast %201 : vector<16xf32> to vector<1x16xf32>
    %cst_60 = arith.constant 1.600000e+01 : f32
    %203 = vector.broadcast %cst_60 : f32 to vector<1x16xf32>
    %204 = arith.divf %202, %203 : vector<1x16xf32>
    %205 = vector.broadcast %204 : vector<1x16xf32> to vector<16x16xf32>
    %206 = arith.subf %200, %205 : vector<16x16xf32>
    %207 = arith.mulf %206, %206 : vector<16x16xf32>
    %cst_61 = arith.constant dense<0.000000e+00> : vector<16xf32>
    %208 = vector.multi_reduction <add>, %207, %cst_61 [0] : vector<16x16xf32> to vector<16xf32>
    %209 = vector.shape_cast %208 : vector<16xf32> to vector<1x16xf32>
    %cst_62 = arith.constant 1.600000e+01 : f32
    %210 = vector.broadcast %cst_62 : f32 to vector<1x16xf32>
    %211 = arith.divf %209, %210 : vector<1x16xf32>
    %212 = vector.broadcast %204 : vector<1x16xf32> to vector<16x16xf32>
    %213 = arith.subf %200, %212 : vector<16x16xf32>
    %cst_63 = arith.constant 9.99999974E-6 : f32
    %214 = vector.broadcast %cst_63 : f32 to vector<1x16xf32>
    %215 = arith.addf %211, %214 : vector<1x16xf32>
    %216 = math.rsqrt %215 : vector<1x16xf32>
    %217 = vector.broadcast %216 : vector<1x16xf32> to vector<16x16xf32>
    %218 = arith.mulf %213, %217 : vector<16x16xf32>
    %c167 = arith.constant 167 : index
    %c0_64 = arith.constant 0 : index
    %219 = vector.load %arg2[%c167, %c0_64] : memref<176x128xf32, #tpu.memory_space<vmem>>, vector<1x16xf32>
    %220 = vector.broadcast %219 : vector<1x16xf32> to vector<16x16xf32>
    %221 = arith.mulf %218, %220 : vector<16x16xf32>
    %c168 = arith.constant 168 : index
    %c0_65 = arith.constant 0 : index
    %222 = vector.load %arg2[%c168, %c0_65] : memref<176x128xf32, #tpu.memory_space<vmem>>, vector<1x16xf32>
    %223 = vector.broadcast %222 : vector<1x16xf32> to vector<16x16xf32>
    %224 = arith.addf %221, %223 : vector<16x16xf32>
    %c0_66 = arith.constant 0 : index
    %c0_67 = arith.constant 0 : index
    %225 = vector.load %arg3[%c0_66, %c0_67] : memref<16x16xf32, #tpu.memory_space<vmem>>, vector<16x16xf32>
    tpu.vector_store %arg3[%c0_66, %c0_67], %224 {strides = array<i32>} : memref<16x16xf32, #tpu.memory_space<vmem>>, vector<16x16xf32>,
    return
  }
  func.func @transform_0(%arg0: i32) -> (i32, i32) {
    %c0_i32 = arith.constant 0 : i32
    %c0_i32_0 = arith.constant 0 : i32
    %c0_i32_1 = arith.constant 0 : i32
    return %c0_i32, %c0_i32_0 : i32, i32
  }
  func.func @transform_1(%arg0: i32) -> (i32, i32) {
    %c0_i32 = arith.constant 0 : i32
    %c0_i32_0 = arith.constant 0 : i32
    %c0_i32_1 = arith.constant 0 : i32
    return %c0_i32, %c0_i32_0 : i32, i32
  }
  func.func @transform_2(%arg0: i32) -> (i32, i32) {
    %c0_i32 = arith.constant 0 : i32
    %c0_i32_0 = arith.constant 0 : i32
    %c0_i32_1 = arith.constant 0 : i32
    return %c0_i32, %c0_i32_0 : i32, i32
  }
}

</mosaic_0001>

<bundles_post_ra>
// kernel: tpu_custom_call.1
= control target key start
LH: loop header
LB: loop body
LE: loop exit
PB: predicated region body
PF: predicated region fallthrough
CT: control target
= control target key end

     0   :  { %7 = vsyncpa [#allocation3], 0  ;;  %s1667_s0 = inlined_call_operand.hbm [shape: f32[16,16], index: 0, kind: input, shape index: {}]   ;;  %s1668_s1 = inlined_call_operand.hbm [shape: f32[176,128], index: 1, kind: input, shape index: {}]   ;;  %s1669_s2 = inlined_call_operand.hbm [shape: f32[16,16], index: 2, kind: output, shape index: {}]  }
   0x1   :  { %8 = vsyncpa [#allocation6], 0 }
   0x2   :  { %9 = vsyncpa [#allocation4], 0  ;;  %s1488_s9 = smov [#allocation2]  }
   0x3   :  { %s15_s10 = sshll.u32 %s1488_s9, 4  ;;  %s16_s10 = int_to_ptr.vmem [resolvable:$true] %s15_s10 }
   0x4   :  { %s1430_s11 = scalar_lea.vmem %s16_s10, 256  ;;  %p1435_p1 = scmp.lt.s32.totalorder %s16_s10, %s16_s10 }
   0x5   :  { %p1431_p0 = scmp.ne.s32.totalorder %s16_s10, %s1430_s11  ;;  %p1436_p2 = scmp.lt.s32.totalorder %s1430_s11, %s1430_s11 }
   0x7   :  { %p1437_p3 = por %p1436_p2, %p1435_p1 }
   0x9   :  { %p1438_p4 = pnand %p1437_p3, %p1431_p0 }
   0xb   :  { %1441 = shalt.err (!%p1438_p4)
}
   0xc   :  { %s1489_s12 = smov 128   ;;  %s1490_s13 = smov 8  }
   0xd   :  { %21 = dma.hbm_to_vmem [thread:$0]  %s1667_s0, 256, %s16_s10, [#allocation3], %s1489_s12, %s1489_s12, %s1490_s13  }
   0xe   :  { %s1491_s16 = smov [#allocation5]  }
   0xf   :  { %s27_s17 = sshll.u32 %s1491_s16, 4  ;;  %s28_s17 = int_to_ptr.vmem [resolvable:$true] %s27_s17 }
  0x10   :  { %s1450_s18 = scalar_lea.vmem %s28_s17, 2816  ;;  %p1455_p6 = scmp.lt.s32.totalorder %s28_s17, %s28_s17 }
  0x11   :  { %p1451_p5 = scmp.ne.s32.totalorder %s28_s17, %s1450_s18  ;;  %p1456_p7 = scmp.lt.s32.totalorder %s1450_s18, %s1450_s18 }
  0x13   :  { %p1457_p8 = por %p1456_p7, %p1455_p6 }
  0x15   :  { %p1458_p9 = pnand %p1457_p8, %p1451_p5 }
  0x17   :  { %1461 = shalt.err (!%p1458_p9)
}
  0x18   :  { %33 = dma.hbm_to_vmem [thread:$0]  %s1668_s1, 2816, %s28_s17, [#allocation6], %s1489_s12, %s1489_s12, %s1490_s13  }
  0x19   :  { %1482 = dma.done.wait [#allocation3], 256  }
  0x1a   :  { %1483 = vsyncadd [#allocation3], 4294967040 }
  0x1b   :  { %1484 = dma.done.wait [#allocation6], 2816  }
  0x1c   :  { %1485 = vsyncadd [#allocation6], 4294964480  ;;  %v1492_v0 = vmov 0.0   ;;  %vm1493_vm0 = vmmov 0   ;;  %v43_v1 = vld [vmem:[#allocation5] sm:$0xff]  ;;  %v44_v2 = vld [vmem:[#allocation5 + $0x8] sm:$0xff]  ;;  %v97_v46 = vlaneseq }
  0x1d   :  { %1225 = vmatprep.subr.bf16.mxu1 %v1492_v0  ;;  %1227 = vmatprep.mubr.msk.bf16.mxu1 %vm1493_vm0, %v1492_v0  ;;  %v1542_v3 = vld [vmem:[#allocation2] sm:$0xff]  ;;  %v46_v4 = vpack.c.bf16 %v44_v2, %v43_v1  ;;  %v1544_v5 = vld [vmem:[#allocation2 + $0x8] sm:$0xff]  ;;  %vm52_vm1 = vcmask 130048   ;;  %v1172_v8 = vld [vmem:[#allocation5 + $0xa0] ss:$0 sm:$0xff]  ;;  %s1494_s0 = smov 80  }
  0x1e   :  { %1237 = vmatprep.subr.bf16.mxu0 %v1492_v0  ;;  %1239 = vmatprep.mubr.msk.bf16.mxu0 %vm1493_vm0, %v1492_v0  ;;  %v45_v6 = vpack.c.bf16 %v1544_v5, %v1542_v3  ;;  %s1495_s1 = smov 96   ;;  %s1496_s21 = smov 72   ;;  %vm155_vm2 = vcmask 1043456   ;;  %vm151_vm3 = vcmask 64512   ;;  %v98_v47 = vshrl.u32 %v97_v46, 7 }
  0x1f   :  { %1226 = vmatpush3.bf16.msra.mxu1 %v46_v4  ;;  %s1497_s22 = smov 88   ;;  %s1498_s23 = smov 112   ;;  %v101_v48 = vand.u32 127, %v97_v46  ;;  %v1501_v53 = vmov -1e+30   ;;  %vm773_vm6 = vcmask 195584  }
  0x20   :  { %1231 = vmatprep.subr.bf16.mxu1 %v1492_v0  ;;  %s1499_s24 = smov 120   ;;  %s1500_s25 = smov 104   ;;  %v102_v49 = vand.u32 1, %v98_v47  ;;  %v99_v51 = vadd.s32 8, %v98_v47  ;;  %vm788_vm7 = vcmask 261120   ;;  %vm1061_vm10 = vcmask 523264  }
  0x21   :  { %v104_v50 = vand.u32 1, %v101_v48  ;;  %s1502_s26 = smov 56   ;;  %s1503_s27 = smov 64  }
  0x22   :  { %1228 = vmatmul.mubr.msk.bf16.vlgmr.msra.gmra.mxu1 %vm52_vm1, %v45_v6  ;;  %v103_v52 = vand.u32 1, %v99_v51  ;;  %s1504_s28 = smov 48   ;;  %s1505_s29 = smov 40  }
  0x23   :  { %1233 = vmatprep.mubr.msk.bf16.mxu1 %vm1493_vm0, %v1492_v0  ;;  %vm105_vm4 = vcmp.eq.s32.totalorder %v102_v49, %v104_v50  ;;  %s1506_s30 = smov 16   ;;  %s1507_s3 = smov 24  }
  0x24   :  { %v107_v54 = vsel %vm105_vm4, 0.0, %v1501_v53  ;;  %vm106_vm5 = vcmp.eq.s32.totalorder %v103_v52, %v104_v50  ;;  %s1508_s4 = smov [#allocation7]  }
  0x25   :  { %v108_v58 = vsel %vm106_vm5, 0.0, %v1501_v53  ;;  %s1159_s5 = sshll.u32 %s1508_s4, 4  ;;  %s1160_s5 = int_to_ptr.vmem [resolvable:$true] %s1159_s5 }
  0x26   :  { %s1462_s6 = scalar_lea.vmem %s1160_s5, 256  ;;  %p1467_p11 = scmp.lt.s32.totalorder %s1160_s5, %s1160_s5 }
  0x27   :  { %p1463_p10 = scmp.ne.s32.totalorder %s1160_s5, %s1462_s6  ;;  %p1468_p12 = scmp.lt.s32.totalorder %s1462_s6, %s1462_s6 }
  0x29   :  { %p1469_p13 = por %p1468_p12, %p1467_p11 }
  0x2b   :  { %p1470_p0 = pnand %p1469_p13, %p1463_p10 }
  0xe2   :  { %v90_v7 = vpop.f32.mrf.mxu1 }
  0xe3   :  { %v91_v11 = vadd.f32 %v1172_v8, %v90_v7 }
  0xe4   :  { %v1229_v9 = vpop.f32.mrf.mxu1 }
  0xe6   :  { %v93_v10 = vpop.f32.mrf.mxu1 }
  0xe7   :  { %v94_v12 = vadd.f32 %v1172_v8, %v93_v10 }
  0xe8   :  { %v1230_v13 = vpop.f32.mrf.mxu1 }
  0xe9   :  { %v1344_v14 = vpack.i.bf16 %v94_v12, %v91_v11  ;;  %v1552_v15 = vpack.c.bf16 %v94_v12, %v91_v11 }
  0xeb   :  { %1345 = vrot.lane.b32.xlu1 %v1344_v14, %s1494_s0  ;;  %1335 = vrot.lane.b32.xlu0 %v1344_v14, %s1495_s1 }
  0xef   :  { %1350 = vrot.lane.b32.xlu1 %v1344_v14, %s1496_s21  ;;  %1340 = vrot.lane.b32.xlu0 %v1344_v14, %s1497_s22 }
  0xf3   :  { %468 = vrot.lane.b32.xlu1 %v1552_v15, %s1498_s23  ;;  %310 = vrot.lane.b32.xlu0 %v1552_v15, %s1499_s24 }
  0xf7   :  { %626 = vrot.lane.b32.xlu1 %v1552_v15, %s1500_s25 }
 0x15d   :  { %v1346_v16 = vpop.permute.xlu1 %1345  ;;  %v1336_v17 = vpop.permute.xlu0 %1335 }
 0x15e   :  { %v1347_v18 = vunpack.i.l.bf16 %v1346_v16  ;;  %v1348_v20 = vunpack.i.h.bf16 %v1346_v16  ;;  %v1337_v21 = vunpack.i.l.bf16 %v1336_v17  ;;  %v1338_v25 = vunpack.i.h.bf16 %v1336_v17 }
 0x160   :  { %435 = vxpose.xlu1.b32.start [1/2] (short) (narrow) %v1347_v18, 8 }
 0x161   :  { %v1341_v19 = vpop.permute.xlu0 %1340  ;;  %v1351_v27 = vpop.permute.xlu1 %1350 }
 0x162   :  { %v1342_v22 = vunpack.i.l.bf16 %v1341_v19  ;;  %v1343_v23 = vunpack.i.h.bf16 %v1341_v19  ;;  %v1352_v28 = vunpack.i.l.bf16 %v1351_v27  ;;  %v1353_v29 = vunpack.i.h.bf16 %v1351_v27 }
 0x164   :  { %436 = vxpose.xlu1.b32.end [2/2] (short) (narrow) %v1348_v20, 8  ;;  %v1354_v24 = vpack.i.bf16 %v1342_v22, %v1337_v21  ;;  %v1356_v26 = vpack.i.bf16 %v1343_v23, %v1338_v25 }
 0x165   :  { %v311_v30 = vpop.permute.xlu0 %310  ;;  %v469_v31 = vpop.permute.xlu1 %468 }
 0x166   :  { %1355 = vxpose.xlu0.b32.start [1/2] (short) (narrow) %v1354_v24, 8 }
 0x169   :  { %v627_v36 = vpop.permute.xlu1 %626 }
 0x16a   :  { %1357 = vxpose.xlu0.b32.end [2/2] (short) (narrow) %v1356_v26, 8 }
 0x16e   :  { %593 = vxpose.xlu0.b32.start [1/2] (short) (narrow) %v1352_v28, 8 }
 0x172   :  { %594 = vxpose.xlu0.b32.end [2/2] (short) (narrow) %v1353_v29, 8 }
 0x1dc   :  { %v451_v39 = vpop.trf.xlu1 }
 0x1dd   :  { %v467_v41 = vpack.c.bf16 %v451_v39, %v451_v39 }
 0x1df   :  { %v474_v42 = vsel %vm155_vm2, %v467_v41, 0 }
 0x1e2   :  { %v1358_v32 = vpop.trf.xlu0 }
 0x1e3   :  { %v1362_v33 = vunpack.i.h.bf16 %v1358_v32  ;;  %v1359_v34 = vunpack.i.l.bf16 %v1358_v32 }
 0x1e5   :  { %v150_v35 = vpack.c.bf16 %v1359_v34, %v1359_v34  ;;  %v309_v38 = vpack.c.bf16 %v1362_v33, %v1362_v33 }
 0x1e7   :  { %v157_v37 = vsel %vm155_vm2, %v150_v35, 0  ;;  %v316_v40 = vsel %vm155_vm2, %v309_v38, 0 }
 0x1e8   :  { %1232 = vmatpush3.bf16.msra.mxu1 %v157_v37 }
 0x1e9   :  { %1243 = vmatprep.subr.bf16.mxu1 %v1492_v0 }
 0x1ea   :  { %v609_v43 = vpop.trf.xlu0 }
 0x1eb   :  { %1234 = vmatmul.mubr.msk.bf16.vlgmr.msra.gmra.mxu1 %vm151_vm3, %v1552_v15  ;;  %v625_v44 = vpack.c.bf16 %v609_v43, %v609_v43 }
 0x1ec   :  { %1244 = vmatpush3.bf16.msra.mxu1 %v316_v40  ;;  %1245 = vmatprep.mubr.msk.bf16.mxu1 %vm1493_vm0, %v1492_v0 }
 0x1ed   :  { %1255 = vmatprep.subr.bf16.mxu1 %v1492_v0  ;;  %v632_v45 = vsel %vm155_vm2, %v625_v44, 0 }
 0x1f3   :  { %1246 = vmatmul.mubr.msk.bf16.vlgmr.msra.gmra.mxu1 %vm151_vm3, %v311_v30 }
 0x1f4   :  { %1256 = vmatpush3.bf16.msra.mxu1 %v474_v42  ;;  %1257 = vmatprep.mubr.msk.bf16.mxu1 %vm1493_vm0, %v1492_v0 }
 0x1f5   :  { %1267 = vmatprep.subr.bf16.mxu1 %v1492_v0 }
 0x1fb   :  { %1258 = vmatmul.mubr.msk.bf16.vlgmr.msra.gmra.mxu1 %vm151_vm3, %v469_v31 }
 0x1fc   :  { %1268 = vmatpush3.bf16.msra.mxu1 %v632_v45  ;;  %1269 = vmatprep.mubr.msk.bf16.mxu1 %vm1493_vm0, %v1492_v0 }
 0x1fd   :  { %1279 = vmatprep.subr.bf16.mxu1 %v1492_v0 }
 0x203   :  { %1270 = vmatmul.mubr.msk.bf16.vlgmr.msra.gmra.mxu1 %vm151_vm3, %v627_v36 }
 0x204   :  { %1283 = vmatprep.mubr.msk.bf16.mxu1 %vm1493_vm0, %v1492_v0 }
 0x2ab   :  { %v193_v55 = vpop.f32.mrf.mxu1 }
 0x2ac   :  { %v194_v56 = vadd.f32 %v193_v55, %v107_v54 }
 0x2ad   :  { %v1235_v57 = vpop.f32.mrf.mxu1 }
 0x2ae   :  { %v200_v59 = vsel %vm52_vm1, %v194_v56, -inf }
 0x2af   :  { %201 = vmax.xlane.f32.xlu0 %v200_v59  ;;  %v196_v60 = vpop.f32.mrf.mxu1 }
 0x2b0   :  { %v197_v61 = vadd.f32 %v196_v60, %v108_v58 }
 0x2b1   :  { %v1236_v62 = vpop.f32.mrf.mxu1 }
 0x2b2   :  { %v203_v63 = vsel %vm52_vm1, %v197_v61, -inf }
 0x2b3   :  { %204 = vmax.xlane.f32.xlu1 %v203_v63  ;;  %v352_v1 = vpop.f32.mrf.mxu1 }
 0x2b4   :  { %v353_v2 = vadd.f32 %v352_v1, %v107_v54 }
 0x2b5   :  { %v1247_v4 = vpop.f32.mrf.mxu1 }
 0x2b6   :  { %v359_v6 = vsel %vm52_vm1, %v353_v2, -inf }
 0x2b7   :  { %360 = vmax.xlane.f32.xlu0 %v359_v6  ;;  %v355_v7 = vpop.f32.mrf.mxu1 }
 0x2b8   :  { %v356_v8 = vadd.f32 %v355_v7, %v108_v58 }
 0x2b9   :  { %v1248_v9 = vpop.f32.mrf.mxu1 }
 0x2ba   :  { %v362_v10 = vsel %vm52_vm1, %v356_v8, -inf }
 0x2bb   :  { %363 = vmax.xlane.f32.xlu1 %v362_v10  ;;  %v510_v11 = vpop.f32.mrf.mxu1 }
 0x2bc   :  { %v511_v12 = vadd.f32 %v510_v11, %v107_v54 }
 0x2bd   :  { %v1259_v13 = vpop.f32.mrf.mxu1 }
 0x2be   :  { %v517_v14 = vsel %vm52_vm1, %v511_v12, -inf }
 0x2bf   :  { %518 = vmax.xlane.f32.xlu0 %v517_v14  ;;  %v513_v16 = vpop.f32.mrf.mxu1 }
 0x2c0   :  { %v514_v17 = vadd.f32 %v513_v16, %v108_v58 }
 0x2c1   :  { %v1260_v18 = vpop.f32.mrf.mxu1 }
 0x2c2   :  { %v520_v19 = vsel %vm52_vm1, %v514_v17, -inf }
 0x2c3   :  { %521 = vmax.xlane.f32.xlu1 %v520_v19  ;;  %v668_v20 = vpop.f32.mrf.mxu1 }
 0x2c4   :  { %v669_v21 = vadd.f32 %v668_v20, %v107_v54 }
 0x2c5   :  { %v1271_v22 = vpop.f32.mrf.mxu1 }
 0x2c6   :  { %v675_v23 = vsel %vm52_vm1, %v669_v21, -inf }
 0x2c7   :  { %676 = vmax.xlane.f32.xlu0 %v675_v23  ;;  %v671_v24 = vpop.f32.mrf.mxu1 }
 0x2c8   :  { %v672_v25 = vadd.f32 %v671_v24, %v108_v58 }
 0x2c9   :  { %v1272_v26 = vpop.f32.mrf.mxu1 }
 0x2ca   :  { %v678_v27 = vsel %vm52_vm1, %v672_v25, -inf }
 0x2cb   :  { %679 = vmax.xlane.f32.xlu1 %v678_v27 }
 0x338   :  { %v202_v28 = vpop.xlane.xlu0 %201 }
 0x339   :  { %v206_v29 = vsub.f32 %v194_v56, %v202_v28 }
 0x33b   :  { %v208_v30 = vmul.f32 1.442695, %v206_v29 }
 0x33c   :  { %v205_v31 = vpop.xlane.xlu1 %204 }
 0x33d   :  { %1378 = vpow2.f32 %v208_v30  ;;  %v207_v32 = vsub.f32 %v197_v61, %v205_v31 }
 0x33f   :  { %v210_v33 = vmul.f32 1.442695, %v207_v32 }
 0x340   :  { %v361_v34 = vpop.xlane.xlu0 %360 }
 0x341   :  { %1380 = vpow2.f32 %v210_v33  ;;  %v365_v35 = vsub.f32 %v353_v2, %v361_v34 }
 0x343   :  { %v367_v36 = vmul.f32 1.442695, %v365_v35 }
 0x344   :  { %v364_v43 = vpop.xlane.xlu1 %363 }
 0x345   :  { %1382 = vpow2.f32 %v367_v36  ;;  %v366_v44 = vsub.f32 %v356_v8, %v364_v43 }
 0x347   :  { %v369_v48 = vmul.f32 1.442695, %v366_v44 }
 0x348   :  { %v519_v45 = vpop.xlane.xlu0 %518 }
 0x349   :  { %v523_v47 = vsub.f32 %v511_v12, %v519_v45  ;;  %1384 = vpow2.f32 %v369_v48 }
 0x34a   :  { %v1379_v37 = vpop.eup %1378 }
 0x34b   :  { %v212_v38 = vsel %vm52_vm1, %v1379_v37, 0.0  ;;  %v525_v52 = vmul.f32 1.442695, %v523_v47  ;;  %v779_v47 = vld [vmem:[#allocation5 + $0x38] sm:$0xff] }
 0x34c   :  { %213 = vadd.xlane.f32.xlu0 %v212_v38  ;;  %v522_v46 = vpop.xlane.xlu1 %521 }
 0x34d   :  { %v524_v49 = vsub.f32 %v514_v17, %v522_v46  ;;  %1386 = vpow2.f32 %v525_v52  ;;  %v778_v46 = vld [vmem:[#allocation5 + $0x30] sm:$0xff] }
 0x34e   :  { %v1381_v39 = vpop.eup %1380 }
 0x34f   :  { %v215_v40 = vsel %vm52_vm1, %v1381_v39, 0.0  ;;  %v527_v54 = vmul.f32 1.442695, %v524_v49  ;;  %v782_v49 = vpack.c.bf16 %v779_v47, %v778_v46 }
 0x350   :  { %216 = vadd.xlane.f32.xlu1 %v215_v40  ;;  %v677_v50 = vpop.xlane.xlu0 %676 }
 0x351   :  { %v681_v53 = vsub.f32 %v669_v21, %v677_v50  ;;  %1388 = vpow2.f32 %v527_v54  ;;  %1280 = vmatpush3.bf16.msra.mxu1 %v782_v49  ;;  %v777_v54 = vld [vmem:[#allocation5 + $0x28] sm:$0xff] }
 0x352   :  { %v1588_v41 = vpop.eup %1382  ;;  %1281 = vmatprep.subr.bf16.mxu1 %v1492_v0 }
 0x353   :  { %v371_v42 = vsel %vm52_vm1, %v1588_v41, 0.0  ;;  %v683_v56 = vmul.f32 1.442695, %v681_v53  ;;  %v776_v53 = vld [vmem:[#allocation5 + $0x20] sm:$0xff] }
 0x354   :  { %372 = vadd.xlane.f32.xlu0 %v371_v42  ;;  %v680_v51 = vpop.xlane.xlu1 %679 }
 0x355   :  { %v682_v55 = vsub.f32 %v672_v25, %v680_v51  ;;  %1390 = vpow2.f32 %v683_v56 }
 0x356   :  { %v1385_v58 = vpop.eup %1384 }
 0x357   :  { %v685_v57 = vmul.f32 1.442695, %v682_v55  ;;  %v374_v60 = vsel %vm52_vm1, %v1385_v58, 0.0  ;;  %v781_v55 = vpack.c.bf16 %v777_v54, %v776_v53 }
 0x359   :  { %1392 = vpow2.f32 %v685_v57  ;;  %1282 = vmatpush3.bf16.msra.mxu1 %v781_v55 }
 0x35a   :  { %v1387_v59 = vpop.eup %1386  ;;  %1295 = vmatprep.subr.bf16.mxu1 %v1492_v0 }
 0x35b   :  { %v529_v63 = vsel %vm52_vm1, %v1387_v59, 0.0 }
 0x35e   :  { %v1389_v61 = vpop.eup %1388 }
 0x35f   :  { %v532_v1 = vsel %vm52_vm1, %v1389_v61, 0.0 }
 0x361   :  { %382 = vrot.lane.b32.xlu1 %v1552_v15, %s1502_s26 }
 0x362   :  { %v1595_v62 = vpop.eup %1390 }
 0x363   :  { %v687_v4 = vsel %vm52_vm1, %v1595_v62, 0.0 }
 0x366   :  { %v1393_v2 = vpop.eup %1392 }
 0x367   :  { %v690_v6 = vsel %vm52_vm1, %v1393_v2, 0.0 }
 0x36a   :  { %224 = vrot.lane.b32.xlu0 %v1552_v15, %s1503_s27 }
 0x385   :  { %375 = vadd.xlane.f32.xlu1 %v374_v60 }
 0x389   :  { %530 = vadd.xlane.f32.xlu0 %v529_v63  ;;  %533 = vadd.xlane.f32.xlu1 %v532_v1 }
 0x38d   :  { %688 = vadd.xlane.f32.xlu0 %v687_v4  ;;  %691 = vadd.xlane.f32.xlu1 %v690_v6 }
 0x39e   :  { %540 = vrot.lane.b32.xlu1 %v1552_v15, %s1504_s28 }
 0x3a3   :  { %698 = vrot.lane.b32.xlu0 %v1552_v15, %s1505_s29 }
 0x3d5   :  { %v214_v7 = vpop.xlane.xlu0 %213 }
 0x3d6   :  { %1394 = vrcp.f32 %v214_v7 }
 0x3d9   :  { %v217_v8 = vpop.xlane.xlu1 %216 }
 0x3da   :  { %1396 = vrcp.f32 %v217_v8 }
 0x3dd   :  { %v373_v9 = vpop.xlane.xlu0 %372  ;;  %v383_v17 = vpop.permute.xlu1 %382 }
 0x3de   :  { %1398 = vrcp.f32 %v373_v9 }
 0x3e1   :  { %v225_v10 = vpop.permute.xlu0 %224 }
 0x3e2   :  { %1238 = vmatpush3.bf16.msra.mxu0 %v225_v10 }
 0x3e3   :  { %1249 = vmatprep.subr.bf16.mxu0 %v1492_v0  ;;  %v1395_v11 = vpop.eup %1394 }
 0x3e4   :  { %v220_v13 = vmul.f32 %v1395_v11, %v1379_v37 }
 0x3e7   :  { %v1397_v12 = vpop.eup %1396 }
 0x3e8   :  { %v221_v14 = vmul.f32 %v1397_v12, %v1381_v39 }
 0x3ea   :  { %v222_v16 = vpack.c.bf16 %v221_v14, %v220_v13 }
 0x3eb   :  { %v1399_v22 = vpop.eup %1398 }
 0x3ec   :  { %1240 = vmatmul.mubr.msk.bf16.vlgmr.msra.gmra.mxu0 %vm52_vm1, %v222_v16  ;;  %v379_v24 = vmul.f32 %v1399_v22, %v1588_v41  ;;  %v833_v22 = vld [vmem:[#allocation5 + $0x40] sm:$0xff] }
 0x3ed   :  { %1250 = vmatpush3.bf16.msra.mxu0 %v383_v17  ;;  %1251 = vmatprep.mubr.msk.bf16.mxu0 %vm1493_vm0, %v1492_v0 }
 0x3ee   :  { %1261 = vmatprep.subr.bf16.mxu0 %v1492_v0 }
 0x40e   :  { %v376_v15 = vpop.xlane.xlu1 %375 }
 0x40f   :  { %1400 = vrcp.f32 %v376_v15 }
 0x412   :  { %v531_v18 = vpop.xlane.xlu0 %530  ;;  %v534_v19 = vpop.xlane.xlu1 %533 }
 0x413   :  { %1402 = vrcp.f32 %v531_v18 }
 0x414   :  { %1404 = vrcp.f32 %v534_v19  ;;  %v835_v19 = vld [vmem:[#allocation5 + $0x50] sm:$0xff] }
 0x416   :  { %v689_v20 = vpop.xlane.xlu0 %688  ;;  %v692_v21 = vpop.xlane.xlu1 %691 }
 0x417   :  { %1406 = vrcp.f32 %v689_v20  ;;  %v836_v20 = vld [vmem:[#allocation5 + $0x58] sm:$0xff] }
 0x418   :  { %1408 = vrcp.f32 %v692_v21  ;;  %v839_v21 = vpack.c.bf16 %v836_v20, %v835_v19  ;;  %v1049_v19 = vld [vmem:[#allocation5 + $0x90] sm:$0xff]  ;;  %v1050_v20 = vld [vmem:[#allocation5 + $0x98] sm:$0xff] }
 0x41a   :  { %v541_v29 = vpop.permute.xlu1 %540  ;;  %v699_v35 = vpop.permute.xlu0 %698 }
 0x41c   :  { %v1401_v23 = vpop.eup %1400 }
 0x41d   :  { %v380_v25 = vmul.f32 %v1401_v23, %v1385_v58  ;;  %v834_v23 = vld [vmem:[#allocation5 + $0x48] sm:$0xff] }
 0x41f   :  { %v381_v26 = vpack.c.bf16 %v380_v25, %v379_v24  ;;  %v838_v24 = vpack.c.bf16 %v834_v23, %v833_v22  ;;  %v1047_v22 = vld [vmem:[#allocation5 + $0x80] sm:$0xff]  ;;  %v1048_v23 = vld [vmem:[#allocation5 + $0x88] sm:$0xff] }
 0x420   :  { %v1403_v27 = vpop.eup %1402 }
 0x421   :  { %v1405_v28 = vpop.eup %1404  ;;  %1252 = vmatmul.mubr.msk.bf16.vlgmr.msra.gmra.mxu0 %vm52_vm1, %v381_v26  ;;  %v537_v30 = vmul.f32 %v1403_v27, %v1387_v59  ;;  %v1182_v26 = vld [vmem:[#allocation5 + $0xa1] ss:$0 sm:$0xff] }
 0x422   :  { %1262 = vmatpush3.bf16.msra.mxu0 %v541_v29  ;;  %1263 = vmatprep.mubr.msk.bf16.mxu0 %vm1493_vm0, %v1492_v0  ;;  %v538_v31 = vmul.f32 %v1405_v28, %v1389_v61 }
 0x423   :  { %1273 = vmatprep.subr.bf16.mxu0 %v1492_v0 }
 0x424   :  { %v1407_v32 = vpop.eup %1406  ;;  %v539_v33 = vpack.c.bf16 %v538_v31, %v537_v30 }
 0x425   :  { %v1409_v34 = vpop.eup %1408  ;;  %v695_v36 = vmul.f32 %v1407_v32, %v1595_v62 }
 0x426   :  { %v696_v37 = vmul.f32 %v1409_v34, %v1393_v2  ;;  %v937_v34 = vld [vmem:[#allocation5 + $0x18] sm:$0xff] }
 0x428   :  { %v697_v38 = vpack.c.bf16 %v696_v37, %v695_v36  ;;  %v1184_v36 = vld [vmem:[#allocation5 + $0xa2] ss:$0 sm:$0xff] }
 0x429   :  { %1264 = vmatmul.mubr.msk.bf16.vlgmr.msra.gmra.mxu0 %vm52_vm1, %v539_v33  ;;  %v936_v33 = vld [vmem:[#allocation5 + $0x10] sm:$0xff] }
 0x42a   :  { %1274 = vmatpush3.bf16.msra.mxu0 %v699_v35  ;;  %1275 = vmatprep.mubr.msk.bf16.mxu0 %vm1493_vm0, %v1492_v0  ;;  %v939_v35 = vpack.c.bf16 %v937_v34, %v936_v33 }
 0x42b   :  { %1287 = vmatprep.subr.bf16.mxu0 %v1492_v0 }
 0x431   :  { %1276 = vmatmul.mubr.msk.bf16.vlgmr.msra.gmra.mxu0 %vm52_vm1, %v697_v38 }
 0x432   :  { %1291 = vmatprep.mubr.msk.bf16.mxu0 %vm1493_vm0, %v1492_v0  ;;  %1288 = vmatpush3.bf16.msra.mxu0 %v839_v21  ;;  %v1055_v21 = vpack.c.bf16 %v1050_v20, %v1049_v19 }
 0x433   :  { %1289 = vmatprep.subr.bf16.mxu0 %v1492_v0 }
 0x436   :  { %1290 = vmatpush3.bf16.msra.mxu0 %v838_v24  ;;  %v1054_v24 = vpack.c.bf16 %v1048_v23, %v1047_v22 }
 0x437   :  { %1301 = vmatprep.subr.bf16.mxu0 %v1492_v0 }
 0x4ac   :  { %v264_v39 = vpop.f32.mrf.mxu0 }
 0x4ae   :  { %v1241_v40 = vpop.f32.mrf.mxu0 }
 0x4b0   :  { %v267_v41 = vpop.f32.mrf.mxu0 }
 0x4b2   :  { %v1242_v42 = vpop.f32.mrf.mxu0 }
 0x4e1   :  { %v422_v43 = vpop.f32.mrf.mxu0 }
 0x4e3   :  { %v1253_v44 = vpop.f32.mrf.mxu0 }
 0x4e5   :  { %v425_v45 = vpop.f32.mrf.mxu0 }
 0x4e6   :  { %v1363_v48 = vpack.i.bf16 %v425_v45, %v422_v43 }
 0x4e7   :  { %v1254_v50 = vpop.f32.mrf.mxu0 }
 0x4e8   :  { %1364 = vrot.lane.b32.xlu1 %v1363_v48, %s1490_s13 }
 0x4e9   :  { %v580_v51 = vpop.f32.mrf.mxu0 }
 0x4eb   :  { %v1265_v52 = vpop.f32.mrf.mxu0 }
 0x4ed   :  { %v583_v56 = vpop.f32.mrf.mxu0 }
 0x4ee   :  { %v1368_v57 = vpack.i.bf16 %v583_v56, %v580_v51 }
 0x4ef   :  { %v1266_v58 = vpop.f32.mrf.mxu0 }
 0x4f0   :  { %1369 = vrot.lane.b32.xlu0 %v1368_v57, %s1506_s30 }
 0x4f1   :  { %v738_v59 = vpop.f32.mrf.mxu0 }
 0x4f3   :  { %v1277_v60 = vpop.f32.mrf.mxu0 }
 0x4f5   :  { %v741_v61 = vpop.f32.mrf.mxu0 }
 0x4f6   :  { %v1373_v62 = vpack.i.bf16 %v741_v61, %v738_v59 }
 0x4f7   :  { %v1278_v63 = vpop.f32.mrf.mxu0 }
 0x4f8   :  { %1374 = vrot.lane.b32.xlu1 %v1373_v62, %s1507_s3 }
 0x55a   :  { %v1365_v1 = vpop.permute.xlu1 %1364 }
 0x55b   :  { %v1367_v4 = vunpack.i.h.bf16 %v1365_v1  ;;  %v1366_v6 = vunpack.i.l.bf16 %v1365_v1 }
 0x55d   :  { %v770_v10 = vsel %vm151_vm3, %v267_v41, %v1367_v4  ;;  %v769_v11 = vsel %vm151_vm3, %v264_v39, %v1366_v6 }
 0x562   :  { %v1370_v2 = vpop.permute.xlu0 %1369 }
 0x563   :  { %v1372_v7 = vunpack.i.h.bf16 %v1370_v2  ;;  %v1371_v8 = vunpack.i.l.bf16 %v1370_v2 }
 0x565   :  { %v771_v14 = vsel %vm52_vm1, %v769_v11, %v1371_v8  ;;  %v772_v16 = vsel %vm52_vm1, %v770_v10, %v1372_v7  ;;  %v1186_v10 = vld [vmem:[#allocation5 + $0xa5] ss:$0 sm:$0xff] }
 0x56a   :  { %v1375_v9 = vpop.permute.xlu1 %1374 }
 0x56b   :  { %v1377_v12 = vunpack.i.h.bf16 %v1375_v9  ;;  %v1376_v13 = vunpack.i.l.bf16 %v1375_v9 }
 0x56d   :  { %v774_v17 = vsel %vm773_vm6, %v771_v14, %v1376_v13  ;;  %v775_v15 = vsel %vm773_vm6, %v772_v16, %v1377_v12  ;;  %v1187_v13 = vld [vmem:[#allocation5 + $0xa6] ss:$0 sm:$0xff] }
 0x56e   :  { %v780_v18 = vpack.c.bf16 %v775_v15, %v774_v17 }
 0x570   :  { %1284 = vmatmul.mubr.msk.bf16.vlgmr.msra.gmra.mxu1 %vm788_vm7, %v780_v18 }
 0x571   :  { %1297 = vmatprep.mubr.msk.bf16.mxu1 %vm1493_vm0, %v1492_v0  ;;  %1296 = vmatpush3.bf16.msra.mxu1 %v939_v35 }
 0x630   :  { %v826_v25 = vpop.f32.mrf.mxu1 }
 0x631   :  { %v827_v29 = vadd.f32 %v1182_v26, %v826_v25  ;;  %v1045_v25 = vld [vmem:[#allocation5 + $0x70] sm:$0xff] }
 0x632   :  { %v1285_v27 = vpop.f32.mrf.mxu1 }
 0x634   :  { %v829_v28 = vpop.f32.mrf.mxu1 }
 0x635   :  { %v830_v30 = vadd.f32 %v1182_v26, %v829_v28  ;;  %v1046_v26 = vld [vmem:[#allocation5 + $0x78] sm:$0xff]  ;;  %v1043_v28 = vld [vmem:[#allocation5 + $0x60] sm:$0xff] }
 0x636   :  { %v1286_v31 = vpop.f32.mrf.mxu1  ;;  %v1053_v27 = vpack.c.bf16 %v1046_v26, %v1045_v25 }
 0x637   :  { %v837_v32 = vpack.c.bf16 %v830_v30, %v827_v29  ;;  %v1044_v29 = vld [vmem:[#allocation5 + $0x68] sm:$0xff]  ;;  %v1188_v31 = vld [vmem:[#allocation5 + $0xa3] ss:$0 sm:$0xff] }
 0x638   :  { %v1052_v30 = vpack.c.bf16 %v1044_v29, %v1043_v28 }
 0x639   :  { %1292 = vmatmul.mubr.msk.bf16.vlgmr.msra.gmra.mxu0 %vm788_vm7, %v837_v32 }
 0x63a   :  { %1309 = vmatprep.mubr.msk.bf16.mxu0 %vm1493_vm0, %v1492_v0  ;;  %1302 = vmatpush3.bf16.msra.mxu0 %v1055_v21 }
 0x63b   :  { %1303 = vmatprep.subr.bf16.mxu0 %v1492_v0 }
 0x63e   :  { %1304 = vmatpush3.bf16.msra.mxu0 %v1054_v24 }
 0x63f   :  { %1305 = vmatprep.subr.bf16.mxu0 %v1492_v0 }
 0x642   :  { %1306 = vmatpush3.bf16.msra.mxu0 %v1053_v27  ;;  %v1190_v27 = vld [vmem:[#allocation5 + $0xa4] ss:$0 sm:$0xff] }
 0x643   :  { %1307 = vmatprep.subr.bf16.mxu0 %v1492_v0 }
 0x646   :  { %1308 = vmatpush3.bf16.msra.mxu0 %v1052_v30 }
 0x6f9   :  { %v882_v37 = vpop.f32.mrf.mxu0 }
 0x6fa   :  { %v883_v38 = vadd.f32 %v1184_v36, %v882_v37 }
 0x6fb   :  { %v1293_v39 = vpop.f32.mrf.mxu0 }
 0x6fc   :  { %v889_v40 = vadd.f32 %v883_v38, %v1542_v3 }
 0x6fd   :  { %v885_v41 = vpop.f32.mrf.mxu0 }
 0x6fe   :  { %v886_v42 = vadd.f32 %v1184_v36, %v885_v41  ;;  %v891_v44 = vmul.f32 0.7072136, %v889_v40 }
 0x6ff   :  { %v1294_v43 = vpop.f32.mrf.mxu0 }
 0x700   :  { %v890_v45 = vadd.f32 %v886_v42, %v1544_v5  ;;  %v893_v47 = vsel %vm52_vm1, %v891_v44, 0.0 }
 0x702   :  { %v892_v46 = vmul.f32 0.7072136, %v890_v45 }
 0x704   :  { %v894_v48 = vsel %vm52_vm1, %v892_v46, 0.0 }
 0x705   :  { %v895_v49 = vadd.f32 %v894_v48, %v893_v47 }
 0x707   :  { %v896_v50 = vrot.slane %v895_v49, 4 }
 0x709   :  { %v897_v51 = vadd.f32 %v896_v50, %v895_v49 }
 0x70b   :  { %v898_v52 = vrot.slane %v897_v51, 2 }
 0x70d   :  { %v899_v53 = vadd.f32 %v898_v52, %v897_v51 }
 0x70f   :  { %v900_v54 = vrot.slane %v899_v53, 1 }
 0x711   :  { %v901_v55 = vadd.f32 %v900_v54, %v899_v53 }
 0x713   :  { %v903_v56 = vmul.f32 0.0625, %v901_v55 }
 0x715   :  { %v904_v3 = vsub.f32 %v891_v44, %v903_v56  ;;  %v905_v57 = vsub.f32 %v892_v46, %v903_v56 }
 0x717   :  { %v906_v58 = vmul.f32 %v904_v3, %v904_v3  ;;  %v907_v59 = vmul.f32 %v905_v57, %v905_v57 }
 0x719   :  { %v908_v60 = vsel %vm52_vm1, %v906_v58, 0.0  ;;  %v909_v5 = vsel %vm52_vm1, %v907_v59, 0.0 }
 0x71a   :  { %v910_v61 = vadd.f32 %v909_v5, %v908_v60 }
 0x71c   :  { %v911_v62 = vrot.slane %v910_v61, 4 }
 0x71e   :  { %v912_v63 = vadd.f32 %v911_v62, %v910_v61 }
 0x720   :  { %v913_v1 = vrot.slane %v912_v63, 2 }
 0x722   :  { %v914_v2 = vadd.f32 %v913_v1, %v912_v63 }
 0x724   :  { %v915_v4 = vrot.slane %v914_v2, 1 }
 0x726   :  { %v916_v6 = vadd.f32 %v915_v4, %v914_v2 }
 0x728   :  { %v917_v7 = vmul.f32 0.0625, %v916_v6 }
 0x72a   :  { %v918_v8 = vadd.f32 1e-05, %v917_v7 }
 0x72c   :  { %1410 = vrsqrt.f32 %v918_v8 }
 0x739   :  { %v1411_v9 = vpop.eup %1410 }
 0x73a   :  { %v920_v11 = vmul.f32 %v1411_v9, %v904_v3  ;;  %v921_v12 = vmul.f32 %v1411_v9, %v905_v57 }
 0x73c   :  { %v927_v14 = vmul.f32 %v1186_v10, %v920_v11  ;;  %v928_v16 = vmul.f32 %v1186_v10, %v921_v12 }
 0x73e   :  { %v1643_v17 = vadd.f32 %v1187_v13, %v927_v14  ;;  %v1645_v15 = vadd.f32 %v1187_v13, %v928_v16 }
 0x740   :  { %v938_v18 = vpack.c.bf16 %v1645_v15, %v1643_v17 }
 0x742   :  { %1298 = vmatmul.mubr.msk.bf16.vlgmr.msra.gmra.mxu1 %vm52_vm1, %v938_v18 }
 0x802   :  { %v982_v32 = vpop.f32.mrf.mxu1 }
 0x803   :  { %v983_v33 = vadd.f32 %v1188_v31, %v982_v32 }
 0x804   :  { %v1299_v34 = vpop.f32.mrf.mxu1 }
 0x805   :  { %v991_v35 = vmul.f32 0.70710677, %v983_v33  ;;  %v989_v21 = vmul.f32 0.5, %v983_v33 }
 0x806   :  { %v985_v36 = vpop.f32.mrf.mxu1 }
 0x807   :  { %v993_v37 = vand.u32 2147483647, %v991_v35  ;;  %v986_v38 = vadd.f32 %v1188_v31, %v985_v36  ;;  %vm1033_vm8 = vcmp.ge.f32.partialorder %v991_v35, 0.0 }
 0x808   :  { %v1300_v39 = vpop.f32.mrf.mxu1 }
 0x809   :  { %v995_v40 = vmul.f32 0.3275911, %v993_v37  ;;  %v992_v41 = vmul.f32 0.70710677, %v986_v38  ;;  %v1021_v45 = vsub.f32 0.0, %v993_v37  ;;  %v990_v22 = vmul.f32 0.5, %v986_v38 }
 0x80b   :  { %v997_v42 = vadd.f32 1.0, %v995_v40  ;;  %v994_v43 = vand.u32 2147483647, %v992_v41  ;;  %v1023_v46 = vmul.f32 %v1021_v45, %v993_v37  ;;  %vm1034_vm9 = vcmp.ge.f32.partialorder %v992_v41, 0.0 }
 0x80d   :  { %1412 = vrcp.f32 %v997_v42  ;;  %v996_v44 = vmul.f32 0.3275911, %v994_v43  ;;  %v1022_v47 = vsub.f32 0.0, %v994_v43  ;;  %v1025_v50 = vmul.f32 1.442695, %v1023_v46 }
 0x80f   :  { %v998_v0 = vadd.f32 1.0, %v996_v44  ;;  %v1024_v51 = vmul.f32 %v1022_v47, %v994_v43 }
 0x811   :  { %1414 = vrcp.f32 %v998_v0  ;;  %v1027_v56 = vmul.f32 1.442695, %v1024_v51 }
 0x812   :  { %1416 = vpow2.f32 %v1025_v50 }
 0x813   :  { %1418 = vpow2.f32 %v1027_v56 }
 0x81a   :  { %v1413_v48 = vpop.eup %1412 }
 0x81b   :  { %v1003_v49 = vmul.f32 1.0614054, %v1413_v48 }
 0x81d   :  { %v1005_v52 = vadd.f32 -1.4531521, %v1003_v49 }
 0x81e   :  { %v1415_v53 = vpop.eup %1414 }
 0x81f   :  { %v1007_v54 = vmul.f32 %v1413_v48, %v1005_v52  ;;  %v1004_v55 = vmul.f32 1.0614054, %v1415_v53  ;;  %v1417_v6 = vpop.eup %1416 }
 0x820   :  { %v1419_v11 = vpop.eup %1418 }
 0x821   :  { %v1009_v3 = vadd.f32 1.4214138, %v1007_v54  ;;  %v1006_v57 = vadd.f32 -1.4531521, %v1004_v55 }
 0x823   :  { %v1011_v58 = vmul.f32 %v1413_v48, %v1009_v3  ;;  %v1008_v59 = vmul.f32 %v1415_v53, %v1006_v57 }
 0x825   :  { %v1013_v60 = vadd.f32 -0.28449672, %v1011_v58  ;;  %v1010_v5 = vadd.f32 1.4214138, %v1008_v59 }
 0x827   :  { %v1015_v61 = vmul.f32 %v1413_v48, %v1013_v60  ;;  %v1012_v62 = vmul.f32 %v1415_v53, %v1010_v5  ;;  %v1192_v60 = vld [vmem:[#allocation5 + $0xa7] ss:$0 sm:$0xff] }
 0x829   :  { %v1017_v63 = vadd.f32 0.2548296, %v1015_v61  ;;  %v1014_v1 = vadd.f32 -0.28449672, %v1012_v62  ;;  %v1193_v62 = vld [vmem:[#allocation5 + $0xa8] ss:$0 sm:$0xff] }
 0x82b   :  { %v1019_v2 = vmul.f32 %v1413_v48, %v1017_v63  ;;  %v1016_v4 = vmul.f32 %v1415_v53, %v1014_v1 }
 0x82d   :  { %v1029_v7 = vmul.f32 %v1417_v6, %v1019_v2  ;;  %v1018_v8 = vadd.f32 0.2548296, %v1016_v4 }
 0x82f   :  { %v1031_v9 = vsub.f32 1.0, %v1029_v7  ;;  %v1020_v10 = vmul.f32 %v1415_v53, %v1018_v8 }
 0x831   :  { %v1035_v12 = vsub.f32 0.0, %v1031_v9  ;;  %v1030_v13 = vmul.f32 %v1419_v11, %v1020_v10 }
 0x833   :  { %v1037_v14 = vsel %vm1033_vm8, %v1031_v9, %v1035_v12  ;;  %v1032_v16 = vsub.f32 1.0, %v1030_v13 }
 0x834   :  { %v1039_v19 = vadd.f32 1.0, %v1037_v14 }
 0x835   :  { %v1036_v18 = vsub.f32 0.0, %v1032_v16 }
 0x836   :  { %v1041_v24 = vmul.f32 %v1039_v19, %v989_v21 }
 0x837   :  { %v1038_v20 = vsel %vm1034_vm9, %v1032_v16, %v1036_v18 }
 0x838   :  { %v1040_v23 = vadd.f32 1.0, %v1038_v20 }
 0x83a   :  { %v1042_v25 = vmul.f32 %v1040_v23, %v990_v22 }
 0x83c   :  { %v1051_v26 = vpack.c.bf16 %v1042_v25, %v1041_v24 }
 0x83e   :  { %1310 = vmatmul.mubr.msk.bf16.vlgmr.msra.gmra.mxu0 %vm1061_vm10, %v1051_v26 }
 0x8fe   :  { %v1099_v28 = vpop.f32.mrf.mxu0 }
 0x8ff   :  { %v1100_v29 = vadd.f32 %v1190_v27, %v1099_v28 }
 0x900   :  { %v1311_v30 = vpop.f32.mrf.mxu0 }
 0x901   :  { %v1106_v31 = vadd.f32 %v1100_v29, %v1643_v17 }
 0x902   :  { %v1102_v32 = vpop.f32.mrf.mxu0 }
 0x903   :  { %v1103_v34 = vadd.f32 %v1190_v27, %v1102_v32  ;;  %v1108_v36 = vmul.f32 0.7072136, %v1106_v31 }
 0x904   :  { %v1312_v35 = vpop.f32.mrf.mxu0 }
 0x905   :  { %v1107_v37 = vadd.f32 %v1103_v34, %v1645_v15  ;;  %v1110_v38 = vsel %vm52_vm1, %v1108_v36, 0.0 }
 0x907   :  { %v1109_v33 = vmul.f32 0.7072136, %v1107_v37 }
 0x909   :  { %v1111_v39 = vsel %vm52_vm1, %v1109_v33, 0.0 }
 0x90a   :  { %v1112_v40 = vadd.f32 %v1111_v39, %v1110_v38 }
 0x90c   :  { %v1113_v41 = vrot.slane %v1112_v40, 4 }
 0x90e   :  { %v1114_v42 = vadd.f32 %v1113_v41, %v1112_v40 }
 0x910   :  { %v1115_v43 = vrot.slane %v1114_v42, 2 }
 0x912   :  { %v1116_v44 = vadd.f32 %v1115_v43, %v1114_v42 }
 0x914   :  { %v1117_v0 = vrot.slane %v1116_v44, 1 }
 0x916   :  { %v1118_v45 = vadd.f32 %v1117_v0, %v1116_v44 }
 0x918   :  { %v1119_v46 = vmul.f32 0.0625, %v1118_v45 }
 0x91a   :  { %v1120_v17 = vsub.f32 %v1108_v36, %v1119_v46  ;;  %v1121_v47 = vsub.f32 %v1109_v33, %v1119_v46 }
 0x91c   :  { %v1122_v48 = vmul.f32 %v1120_v17, %v1120_v17  ;;  %v1123_v49 = vmul.f32 %v1121_v47, %v1121_v47 }
 0x91e   :  { %v1124_v50 = vsel %vm52_vm1, %v1122_v48, 0.0  ;;  %v1125_v15 = vsel %vm52_vm1, %v1123_v49, 0.0 }
 0x91f   :  { %v1126_v51 = vadd.f32 %v1125_v15, %v1124_v50 }
 0x921   :  { %v1127_v52 = vrot.slane %v1126_v51, 4 }
 0x923   :  { %v1128_v53 = vadd.f32 %v1127_v52, %v1126_v51 }
 0x925   :  { %v1129_v54 = vrot.slane %v1128_v53, 2 }
 0x927   :  { %v1130_v55 = vadd.f32 %v1129_v54, %v1128_v53 }
 0x929   :  { %v1131_v56 = vrot.slane %v1130_v55, 1 }
 0x92b   :  { %v1132_v3 = vadd.f32 %v1131_v56, %v1130_v55 }
 0x92d   :  { %v1133_v57 = vmul.f32 0.0625, %v1132_v3 }
 0x92f   :  { %v1134_v58 = vadd.f32 1e-05, %v1133_v57 }
 0x931   :  { %1420 = vrsqrt.f32 %v1134_v58 }
 0x93e   :  { %v1421_v59 = vpop.eup %1420 }
 0x93f   :  { %v1136_v5 = vmul.f32 %v1421_v59, %v1120_v17  ;;  %v1137_v61 = vmul.f32 %v1421_v59, %v1121_v47 }
 0x941   :  { %v1144_v63 = vmul.f32 %v1192_v60, %v1137_v61  ;;  %v1143_v1 = vmul.f32 %v1192_v60, %v1136_v5 }
 0x943   :  { %v1150_v2 = vadd.f32 %v1193_v62, %v1143_v1  ;;  %v1151_v4 = vadd.f32 %v1193_v62, %v1144_v63 }
 0x945   :  { %1152 = vst.msk [vmem:[#allocation7] sm:$0xff] %vm52_vm1, %v1150_v2  ;;  %1153 = vst.msk [vmem:[#allocation7 + $0x8] sm:$0xff] %vm52_vm1, %v1151_v4 }
 0x946   :  { %1473 = shalt.err (!%p1470_p0)
}
 0x947   :  { %1165 = dma.vmem_to_hbm [thread:$0]  %s1160_s5, 256, %s1669_s2, [#allocation4], %s1489_s12, %s1489_s12, %s1490_s13  }
 0x948   :  { %1486 = dma.done.wait [#allocation4], 256  }
 0x949   :  { %1487 = vsyncadd [#allocation4], 4294967040 }
 0x94a   :  { %1169 = vsyncpa [#allocation3], 1 }
 0x94b   :  { %1170 = vsyncpa [#allocation6], 1 }
 0x94c   :  { %1171 = vsyncpa [#allocation4], 1 }

</bundles_post_ra>
